<compile_context>
chip_gen: v7x
topology: tpu7x:2x2x1
jax: 0.10.0
libtpu: 0.0.40
codegen_flags: <defaults>
</compile_context>

<pallas_src>
from functools import partial

import numpy as np

import jax
import jax.numpy as jnp
from jax.experimental import pallas as pl
from jax.experimental.pallas import tpu as pltpu


# -----------------------------------------------------------------------------
# Kernel: fused fc1 -> ReLU -> fc2, batch-on-lanes layout, all compute in f32.
#   xT_ref : [F, TB]   (one batch tile per grid step, double-buffered)
#   w1_ref : [H, F]    (resident)     b1_ref : [H, 1] (resident)
#   w2_ref : [H, 1]    (resident)     b2_ref : [1, 1] (resident)
#   o_ref  : [1, TB]   (lane-dense output tile)
# -----------------------------------------------------------------------------
def _mlp_kernel(xT_ref, w1_ref, b1_ref, w2_ref, b2_ref, o_ref):
    xT = xT_ref[...]                                         # [F, TB]
    # fc1 on the MXU: [H, F] @ [F, TB] -> [H, TB]; N = TB is lane-dense.
    h = jnp.dot(w1_ref[...], xT,
                preferred_element_type=jnp.float32)          # [H, TB]
    h = jnp.maximum(h + b1_ref[...], 0.0)                    # bias + ReLU (VPU)
    # fc2 (H -> 1) as VPU multiply + sublane reduce; avoids an N=1 MXU matmul.
    o = jnp.sum(h * w2_ref[...], axis=0, keepdims=True)      # [1, TB]
    o_ref[...] = o + b2_ref[...]


def _round_up(n, m):
    return ((n + m - 1) // m) * m


@partial(jax.jit, static_argnames=("tile_b",))
def net_forward_pallas_f32(x, w1, b1, w2, b2, *, tile_b=131072):
    """Pallas path.  x: [B, F] f32 -> [B, 1] f32 (device array).

    Params (kernel layout): w1 [H, F], b1 [H, 1], w2 [H, 1], b2 [1, 1].
    """
    B, F = x.shape
    H = w1.shape[0]

    tile_b = max(128, _round_up(int(tile_b), 128))
    # Pad the batch only to a lane multiple (128); the grid uses cdiv and Pallas
    # clips the partial last block, so no tile-sized padding waste.
    Bp = _round_up(B, 128)
    # Target ~>=8 grid steps for large batches (v7x megacore sharding + pipeline
    # overlap), capped by tile_b; never below 128 lanes.
    tb = min(tile_b, max(128, _round_up(pl.cdiv(Bp, 8), 128)))
    grid = (pl.cdiv(Bp, tb),)

    # Batch-on-lanes layout: features on sublanes, batch on lanes.  Under jit
    # this pad(transpose(x)) is a single fused producer; allow_input_fusion
    # lets XLA pull it into the kernel's input DMA instead of writing xT to HBM.
    xT = jnp.pad(x.T, ((0, 0), (0, Bp - B)))                 # [F, Bp]

    flops = 2 * Bp * (F * H + H * 1)
    bytes_accessed = 4 * (F * Bp + H * F + 2 * H + 1 + Bp)

    # VMEM working set: x tile (7->8 sublanes) + out tile (1->8 sublanes), each
    # 32*tb bytes, double-buffered.  ~16 MiB at tb=131072.  Set the scoped limit
    # explicitly so v5e (smaller default) accepts it; cap below v7x's 64 MiB.
    vmem_needed = 4 * (32 * tb) + (2 << 20)
    vmem_limit = int(min(max(vmem_needed, 32 << 20), 56 << 20))

    out = pl.pallas_call(
        _mlp_kernel,
        out_shape=jax.ShapeDtypeStruct((1, Bp), jnp.float32),
        grid=grid,
        in_specs=[
            pl.BlockSpec((F, tb), lambda i: (0, i)),   # x tile: streamed/pipelined
            pl.BlockSpec((H, F), lambda i: (0, 0)),    # w1: resident in VMEM
            pl.BlockSpec((H, 1), lambda i: (0, 0)),    # b1: resident
            pl.BlockSpec((H, 1), lambda i: (0, 0)),    # w2: resident
            pl.BlockSpec((1, 1), lambda i: (0, 0)),    # b2: resident
        ],
        out_specs=pl.BlockSpec((1, tb), lambda i: (0, i)),   # lane-dense output
        compiler_params=pltpu.CompilerParams(
            dimension_semantics=("parallel",),
            allow_input_fusion=[True, False, False, False, False],
            vmem_limit_bytes=vmem_limit),
        cost_estimate=pl.CostEstimate(
            flops=flops, transcendentals=0, bytes_accessed=bytes_accessed),
    )(xT, w1, b1, w2, b2)

    # [1, Bp] -> drop batch padding -> [B, 1] (same memory order; free reshape).
    return out[:, :B].reshape(B, 1)


# Small-batch fast path: one fused XLA op beats a pallas_call at tiny B.
_net_forward_xla_f32 = jax.jit(
    lambda x, w1, b1, w2, b2: jnp.maximum(x @ w1.T + b1.T, 0.0) @ w2 + b2)


def net_forward_f32(x, w1, b1, w2, b2, *, tile_b=131072,
                    small_batch_threshold=2048):
    """Dispatcher: XLA fast path for small B, Pallas kernel otherwise."""
    if x.shape[0] < small_batch_threshold:
        return _net_forward_xla_f32(x, w1, b1, w2, b2)
    return net_forward_pallas_f32(x, w1, b1, w2, b2, tile_b=tile_b)


def net_forward(x, w1, b1, w2, b2, *, tile_b=131072):
    """Full PyTorch-equivalent forward: returns float64 [B, 1] (host array).

    The `.double()` cast is done on host: TPU has no native f64.  Note this
    forces a device sync per call (same semantics as the PyTorch module's
    returned tensor being materialized).
    """
    out_f32 = net_forward_f32(x, w1, b1, w2, b2, tile_b=tile_b)
    return np.asarray(jax.device_get(out_f32), dtype=np.float64)


# -----------------------------------------------------------------------------
# Deterministic parameter init (PyTorch nn.Linear default: U(-1/sqrt(fan_in), +)).
# Stored directly in the kernel layouts: w1 [H, F] (== PyTorch [out, in]),
# b1 [H, 1], w2 [H, 1] (PyTorch [1, H] transposed), b2 [1, 1].
# -----------------------------------------------------------------------------
def init_params(key, input_dim=7, hidden_dim=20, output_dim=1):
    k1, k2, k3, k4 = jax.random.split(key, 4)
    bound1 = 1.0 / float(np.sqrt(input_dim))
    bound2 = 1.0 / float(np.sqrt(hidden_dim))
    w1 = jax.random.uniform(k1, (hidden_dim, input_dim), jnp.float32,
                            -bound1, bound1)
    b1 = jax.random.uniform(k2, (hidden_dim, 1), jnp.float32, -bound1, bound1)
    w2 = jax.random.uniform(k3, (hidden_dim, output_dim), jnp.float32,
                            -bound2, bound2)
    b2 = jax.random.uniform(k4, (1, output_dim), jnp.float32, -bound2, bound2)
    return w1, b1, w2, b2


if __name__ == "__main__":
    key = jax.random.PRNGKey(0)
    k_x, k_p = jax.random.split(key)

    B, INPUT_DIM, HIDDEN_DIM, OUTPUT_DIM = 8, 7, 20, 1
    x = jax.random.normal(k_x, (B, INPUT_DIM), jnp.float32)
    w1, b1, w2, b2 = init_params(k_p, INPUT_DIM, HIDDEN_DIM, OUTPUT_DIM)

    # --- Check 1: run the Pallas kernel directly (single-tile grid) ----------
    out_f32 = net_forward_pallas_f32(x, w1, b1, w2, b2)
    jax.block_until_ready(out_f32)
    out = np.asarray(out_f32, dtype=np.float64)          # the PyTorch .double()

    ref_f32 = jnp.maximum(x @ w1.T + b1.T, 0.0) @ w2 + b2   # [B, 1] f32
    ref = np.asarray(ref_f32, dtype=np.float64)

    assert out.shape == (B, OUTPUT_DIM)
    assert out.dtype == np.float64
    assert np.allclose(out, ref, atol=1e-4, rtol=1e-4)

    # --- Check 2: multi-step grid with a partial last block ------------------
    # (B=1100 -> Bp=1152, tb=256, grid=5 with a clipped final block.)
    B2 = 1100
    x2 = jax.random.normal(jax.random.PRNGKey(1), (B2, INPUT_DIM), jnp.float32)
    out2 = np.asarray(jax.block_until_ready(
        net_forward_pallas_f32(x2, w1, b1, w2, b2)))
    ref2 = np.asarray(jnp.maximum(x2 @ w1.T + b1.T, 0.0) @ w2 + b2)
    # Looser tolerance: the XLA reference's second matmul may round operands to
    # bf16 on the MXU, while the kernel keeps fc2 in full f32 on the VPU.
    assert out2.shape == (B2, OUTPUT_DIM)
    assert np.allclose(out2, ref2, atol=5e-3, rtol=5e-3)

    # --- End-to-end wrapper (small-B dispatches to the XLA fast path) --------
    out_full = net_forward(x, w1, b1, w2, b2)
    assert out_full.dtype == np.float64 and out_full.shape == (B, OUTPUT_DIM)

    print("KERNEL_OK")
</pallas_src>

<mosaic_0001>
module attributes {stable_mosaic.version = 11 : i64} {
  func.func @_mlp_kernel(%arg0: i32, %arg1: memref<7x128xf32, #tpu.memory_space<vmem>>, %arg2: memref<20x7xf32, #tpu.memory_space<vmem>>, %arg3: memref<20x1xf32, #tpu.memory_space<vmem>>, %arg4: memref<20x1xf32, #tpu.memory_space<vmem>>, %arg5: memref<1x1xf32, #tpu.memory_space<vmem>>, %arg6: memref<1x128xf32, #tpu.memory_space<vmem>>) attributes {dimension_semantics = [#tpu.dimension_semantics<parallel>], iteration_bounds = array<i64: 1>, scalar_prefetch = 0 : i64, scratch_operands = 0 : i64, tpu.core_type = #tpu.core_type<tc>, window_params = [{transform_indices = @transform_0, window_bounds = array<i64: 7, 128>}, {pipeline_mode = #tpu.pipeline_mode<synchronous>, transform_indices = @transform_1, window_bounds = array<i64: 20, 7>}, {pipeline_mode = #tpu.pipeline_mode<synchronous>, transform_indices = @transform_2, window_bounds = array<i64: 20, 1>}, {pipeline_mode = #tpu.pipeline_mode<synchronous>, transform_indices = @transform_3, window_bounds = array<i64: 20, 1>}, {pipeline_mode = #tpu.pipeline_mode<synchronous>, transform_indices = @transform_4, window_bounds = array<i64: 1, 1>}, {transform_indices = @transform_5, window_bounds = array<i64: 1, 128>}]} {
    %c0 = arith.constant 0 : index
    %c0_0 = arith.constant 0 : index
    %0 = vector.load %arg1[%c0, %c0_0] : memref<7x128xf32, #tpu.memory_space<vmem>>, vector<7x128xf32>
    %c0_1 = arith.constant 0 : index
    %c0_2 = arith.constant 0 : index
    %1 = vector.load %arg2[%c0_1, %c0_2] : memref<20x7xf32, #tpu.memory_space<vmem>>, vector<20x7xf32>
    %cst = arith.constant dense<0.000000e+00> : vector<20x128xf32>
    %2 = tpu.matmul %1, %0, %cst {dimension_numbers = #tpu.dot_dimension_numbers<[1], [0], [0], [1], [0, 0, 1, 1], [], []>} : vector<20x7xf32>, vector<7x128xf32>, vector<20x128xf32> -> vector<20x128xf32>
    %c0_3 = arith.constant 0 : index
    %c0_4 = arith.constant 0 : index
    %3 = vector.load %arg3[%c0_3, %c0_4] : memref<20x1xf32, #tpu.memory_space<vmem>>, vector<20x1xf32>
    %4 = vector.broadcast %3 : vector<20x1xf32> to vector<20x128xf32>
    %5 = arith.addf %2, %4 : vector<20x128xf32>
    %cst_5 = arith.constant 0.000000e+00 : f32
    %6 = vector.broadcast %cst_5 : f32 to vector<20x128xf32>
    %7 = arith.maximumf %5, %6 : vector<20x128xf32>
    %c0_6 = arith.constant 0 : index
    %c0_7 = arith.constant 0 : index
    %8 = vector.load %arg4[%c0_6, %c0_7] : memref<20x1xf32, #tpu.memory_space<vmem>>, vector<20x1xf32>
    %9 = vector.broadcast %8 : vector<20x1xf32> to vector<20x128xf32>
    %10 = arith.mulf %7, %9 : vector<20x128xf32>
    %cst_8 = arith.constant dense<0.000000e+00> : vector<128xf32>
    %11 = vector.multi_reduction <add>, %10, %cst_8 [0] : vector<20x128xf32> to vector<128xf32>
    %12 = vector.shape_cast %11 : vector<128xf32> to vector<1x128xf32>
    %c0_9 = arith.constant 0 : index
    %c0_10 = arith.constant 0 : index
    %13 = vector.load %arg5[%c0_9, %c0_10] : memref<1x1xf32, #tpu.memory_space<vmem>>, vector<1x1xf32>
    %14 = vector.broadcast %13 : vector<1x1xf32> to vector<1x128xf32>
    %15 = arith.addf %12, %14 : vector<1x128xf32>
    %c0_11 = arith.constant 0 : index
    %c0_12 = arith.constant 0 : index
    %16 = vector.load %arg6[%c0_11, %c0_12] : memref<1x128xf32, #tpu.memory_space<vmem>>, vector<1x128xf32>
    tpu.vector_store %arg6[%c0_11, %c0_12], %15 {strides = array<i32>} : memref<1x128xf32, #tpu.memory_space<vmem>>, vector<1x128xf32>,
    return
  }
  func.func @transform_0(%arg0: i32) -> (i32, i32) {
    %c0_i32 = arith.constant 0 : i32
    %c0_i32_0 = arith.constant 0 : i32
    return %c0_i32, %arg0 : i32, i32
  }
  func.func @transform_1(%arg0: i32) -> (i32, i32) {
    %c0_i32 = arith.constant 0 : i32
    %c0_i32_0 = arith.constant 0 : i32
    %c0_i32_1 = arith.constant 0 : i32
    return %c0_i32, %c0_i32_0 : i32, i32
  }
  func.func @transform_2(%arg0: i32) -> (i32, i32) {
    %c0_i32 = arith.constant 0 : i32
    %c0_i32_0 = arith.constant 0 : i32
    %c0_i32_1 = arith.constant 0 : i32
    return %c0_i32, %c0_i32_0 : i32, i32
  }
  func.func @transform_3(%arg0: i32) -> (i32, i32) {
    %c0_i32 = arith.constant 0 : i32
    %c0_i32_0 = arith.constant 0 : i32
    %c0_i32_1 = arith.constant 0 : i32
    return %c0_i32, %c0_i32_0 : i32, i32
  }
  func.func @transform_4(%arg0: i32) -> (i32, i32) {
    %c0_i32 = arith.constant 0 : i32
    %c0_i32_0 = arith.constant 0 : i32
    %c0_i32_1 = arith.constant 0 : i32
    return %c0_i32, %c0_i32_0 : i32, i32
  }
  func.func @transform_5(%arg0: i32) -> (i32, i32) {
    %c0_i32 = arith.constant 0 : i32
    %c0_i32_0 = arith.constant 0 : i32
    return %c0_i32, %arg0 : i32, i32
  }
}

</mosaic_0001>

<bundles_post_ra>
// kernel: net_forward_pallas_f32.2
= control target key start
LH: loop header
LB: loop body
LE: loop exit
PB: predicated region body
PF: predicated region fallthrough
CT: control target
= control target key end

     0   :  { %s313_s0 = inlined_call_operand.vmem [shape: f32[20,7], index: 0, kind: input, shape index: {}]   ;;  %s314_s1 = inlined_call_operand.vmem [shape: f32[20,1], index: 1, kind: input, shape index: {}]   ;;  %s315_s2 = inlined_call_operand.vmem [shape: f32[20,1], index: 2, kind: input, shape index: {}]   ;;  %s316_s3 = inlined_call_operand.<no memory space> [shape: f32[1,1], index: 3, kind: input, shape index: {}]   ;;  %s317_s4 = inlined_call_operand.vmem [shape: f32[7,8], index: 4, kind: input, shape index: {}]   ;;  %s318_s5 = inlined_call_operand.<no memory space> [shape: f32[], index: 5, kind: input, shape index: {}]   ;;  %s319_s6 = inlined_call_operand.vmem [shape: f32[1,128], index: 6, kind: output, shape index: {}]  }
   0x1   :  { %v11_v0 = vstv %s318_s5  ;;  %v12_v1 = vstv %s316_s3 }
   0x2   :  { %13 = vst [vmem:[#allocation7] sm:$0x1] %v12_v1 }
   0x3   :  { %v25_v2 = vlaneseq  ;;  %v229_v3 = vmov 0.0   ;;  %v41_v4 = vld [vmem:[%s314_s1] sm:$0xff]  ;;  %vm230_vm0 = vmmov 0   ;;  %v43_v8 = vld [vmem:[%s314_s1 + $0x10] sm:$0xf]  ;;  %v231_v9 = vmov 0  }
   0x4   :  { %211 = vmatprep.subr.mxu0 %v229_v3  ;;  %222 = vmatprep.subr.mxu1 %v229_v3  ;;  %v24_v5 = vld [vmem:[%s317_s4] sm:$0x7f]  ;;  %v42_v11 = vld [vmem:[%s314_s1 + $0x8] sm:$0xff]  ;;  %v158_v15 = vld [vmem:[%s315_s2 + $0x10] sm:$0xf]  ;;  %vm69_vm3 = vcmask 1046528  }
   0x5   :  { %v279_v6 = vshrl.u32 %v25_v2, 7  ;;  %v31_v7 = vand.u32 127, %v25_v2  ;;  %213 = vmatprep.mubr.msk.f32.mxu0 %vm230_vm0, %v229_v3  ;;  %216 = vmatprep.mubr.msk.f32.mxu1 %vm230_vm0, %v229_v3  ;;  %v156_v12 = vld [vmem:[%s315_s2] sm:$0xff]  ;;  %v157_v14 = vld [vmem:[%s315_s2 + $0x8] sm:$0xff]  ;;  %vm59_vm4 = vcmask 56320   ;;  %vm178_vm5 = vcmask 1043456  }
   0x6   :  { %227 = vset.pattern.permute.xlu0 %v231_v9  ;;  %228 = vset.pattern.permute.xlu1 %v231_v9  ;;  %v38_v16 = vld [vmem:[%s313_s0] sm:$0xff]  ;;  %v39_v17 = vld [vmem:[%s313_s0 + $0x8] sm:$0xff]  ;;  %v40_v20 = vld [vmem:[%s313_s0 + $0x10] sm:$0xf] }
   0x7   :  { %vm28_vm1 = vcmp.lt.s32.totalorder %v279_v6, 7  ;;  %vm33_vm2 = vcmp.lt.s32.totalorder %v31_v7, 8  ;;  %46 = vperm.xlu0 %227, %v41_v4   ;;  %56 = vperm.xlu1 %228, %v43_v8   ;;  %v195_v48 = vsub.s32 0, %v279_v6 }
   0x8   :  { %v29_v10 = vsel %vm28_vm1, %v24_v5, %v11_v0 }
   0x9   :  { %v34_v13 = vsel %vm33_vm2, %v29_v10, %v11_v0  ;;  %v187_v19 = vld [vmem:[#allocation7] sm:$0x1] }
   0xa   :  { %36 = vst [vmem:[#allocation8] sm:$0xff] %v34_v13 }
   0xb   :  { %51 = vperm.xlu0 %227, %v42_v11   ;;  %161 = vperm.xlu1 %228, %v156_v12  }
   0xf   :  { %166 = vperm.xlu0 %227, %v157_v14   ;;  %171 = vperm.xlu1 %228, %v158_v15  }
  0x11   :  { %v37_v18 = vld [vmem:[#allocation8] sm:$0x7f] }
  0x12   :  { %212 = vmatpush3.msk.msra.mxu0 %vm69_vm3, %v37_v18  ;;  %223 = vmatpush3.msk.msra.mxu1 %vm69_vm3, %v37_v18 }
  0x13   :  { %214 = vmatmul.mubr.msk.f32.vlgmr.msra.gmra.mrb[0].mxu0 %vm59_vm4, %v38_v16  ;;  %217 = vmatmul.mubr.msk.f32.vlgmr.msra.gmra.mrb[0].mxu1 %vm59_vm4, %v39_v17 }
  0x14   :  { %219 = vmatprep.mubr.msk.f32.mxu1 %vm230_vm0, %v229_v3  ;;  %190 = vperm.xlu0 %227, %v187_v19  }
  0x17   :  { %220 = vmatmul.mubr.msk.f32.gmra.mrb[2].mxu1 %vm59_vm4, %v40_v20 }
  0x86   :  { %v47_v21 = vpop.permute.xlu0 %46  ;;  %v57_v22 = vpop.permute.xlu1 %56 }
  0x8a   :  { %v52_v23 = vpop.permute.xlu0 %51  ;;  %v162_v30 = vpop.permute.xlu1 %161 }
  0x8e   :  { %v167_v33 = vpop.permute.xlu0 %166  ;;  %v172_v41 = vpop.permute.xlu1 %171 }
  0x93   :  { %v191_v50 = vpop.permute.xlu0 %190 }
  0x94   :  { %v196_v52 = vrot.slane %v191_v50, %v195_v48 }
  0xe6   :  { %v139_v24 = vpop.f32.mrb[0].mxu0  ;;  %v144_v25 = vpop.f32.mrb[0].mxu1 }
  0xe7   :  { %v140_v26 = vadd.f32 %v139_v24, %v47_v21  ;;  %v145_v27 = vadd.f32 %v144_v25, %v52_v23  ;;  %v218_v28 = vpop.f32.mrb[1].mxu1  ;;  %v215_v29 = vpop.f32.mrb[1].mxu0 }
  0xe9   :  { %v153_v31 = vmax.f32 %v140_v26, 0.0  ;;  %v154_v32 = vmax.f32 %v145_v27, 0.0 }
  0xea   :  { %v149_v34 = vpop.f32.mrb[2].mxu1 }
  0xeb   :  { %v174_v35 = vmul.f32 %v162_v30, %v153_v31  ;;  %v175_v36 = vmul.f32 %v167_v33, %v154_v32  ;;  %v150_v37 = vadd.f32 %v149_v34, %v57_v22  ;;  %v221_v38 = vpop.f32.mrb[3].mxu1 }
  0xed   :  { %v177_v39 = vadd.f32 %v175_v36, %v174_v35  ;;  %v155_v40 = vmax.f32 %v150_v37, 0.0 }
  0xef   :  { %v176_v42 = vmul.f32 %v172_v41, %v155_v40 }
  0xf1   :  { %v179_v43 = vsel %vm178_vm5, %v176_v42, 0.0 }
  0xf2   :  { %v180_v44 = vadd.f32 %v179_v43, %v177_v39 }
  0xf4   :  { %v181_v45 = vrot.slane %v180_v44, 4 }
  0xf6   :  { %v182_v46 = vadd.f32 %v181_v45, %v180_v44 }
  0xf8   :  { %v183_v47 = vrot.slane %v182_v46, 2 }
  0xfa   :  { %v184_v49 = vadd.f32 %v183_v47, %v182_v46 }
  0xfc   :  { %v185_v51 = vrot.slane %v184_v49, 1 }
  0xfe   :  { %v186_v53 = vadd.f32 %v185_v51, %v184_v49 }
 0x100   :  { %v197_v54 = vadd.f32 %v196_v52, %v186_v53 }
 0x102   :  { %198 = vst [vmem:[%s319_s6] sm:$0x1] %v197_v54 }

</bundles_post_ra>
